<compile_context>
chip_gen: v7x
topology: tpu7x:2x2x1
jax: 0.10.0
libtpu: 0.0.40
codegen_flags: <defaults>
</compile_context>

<pallas_src>
import jax
import jax.numpy as jnp
from jax.experimental import pallas as pl
from jax.experimental.pallas import tpu as pltpu

MAX_LEN = 256
_NEG_BIG = -1e30          # finite "-inf" for padded vocab columns / LSE init


def _round_up(x, mult):
    return (x + mult - 1) // mult * mult


def _vmem_budget_bytes():
    """Scoped-VMEM budget with headroom for Mosaic internals.

    v5e/v6e have 128 MiB physical VMEM per TensorCore, v7x only 64 MiB, so the
    limit is derived from the device and capped well below physical capacity.
    """
    cap = 128 << 20
    try:
        cap = int(pltpu.get_tpu_info().vmem_capacity_bytes)
    except Exception:
        pass  # fall back to the conservative cap below
    return int(min(cap * 6 // 10, 48 << 20))


def _pick_tile_v(V, n, m, d, budget, hint=None):
    """Lane-dense vocab tile width.

    Big enough to amortize the ~0.35us/grid-step overhead and keep the output
    store unmasked (multiple of 128), small enough that the double-buffered
    streamed W tile + bias + o tile + logits temp fit the VMEM budget.
    Never wider than half the vocab so both halves of the 2-way split carry
    real columns whenever possible.
    """
    # bytes of VMEM per vocab column of a tile (double-buffered streams):
    #   W^T bf16 (2 bufs) + bias f32 (2 bufs) + o f32 (2 bufs) + logits/exp temps
    per_col = 4 * d + 8 + 8 * m + 8 * n
    resident = 2 * d * (n + m) + 64 * n + (2 << 20)   # fembs, qe, lse, slack
    tv_cap = max((budget - resident) // per_col, 128)
    tv_cap = (tv_cap // 128) * 128
    half = _round_up(pl.cdiv(V, 2), 128)
    tv = min(tv_cap, 4096, half)
    if hint is not None:
        tv = min(tv, max(_round_up(int(hint), 128), 128))
    return max(int(tv), 128)


# --------------------------------------------------------------------------- #
# Fused vocab sweep:
#   per tile:  logits = fembs @ W^T_tile + b_tile   -> online logsumexp scratch
#              o_tile = qe    @ W^T_tile + b_tile   -> streamed straight out
#   last tile of each half: write the half's partial LSE.
# --------------------------------------------------------------------------- #
def _fused_vocab_kernel(fembs_ref, qe_ref, woutT_ref, bias_ref,
                        o_ref, lse_ref, max_sc, sum_sc):
    j = pl.program_id(1)

    @pl.when(j == 0)
    def _init():
        max_sc[...] = jnp.full_like(max_sc, _NEG_BIG)
        sum_sc[...] = jnp.zeros_like(sum_sc)

    w_tile = woutT_ref[...]                              # (d, tile_v) bf16
    b_tile = bias_ref[...]                               # (1, tile_v) f32

    # (n, tile_v) logits tile on the MXU (bf16 operands, f32 accumulate),
    # then online logsumexp over the vocab axis in f32.
    logits = jnp.dot(fembs_ref[...], w_tile,
                     preferred_element_type=jnp.float32) + b_tile
    m_new = jnp.maximum(max_sc[...], jnp.max(logits, axis=-1, keepdims=True))
    sum_sc[...] = (sum_sc[...] * jnp.exp(max_sc[...] - m_new)
                   + jnp.sum(jnp.exp(logits - m_new), axis=-1, keepdims=True))
    max_sc[...] = m_new

    # Output tile: (w @ fembs) @ W^T + b ; the "- w @ lse" correction is a
    # tiny XLA epilogue in the wrapper (fused with the final slice).
    o_ref[...] = jnp.dot(qe_ref[...], w_tile,
                         preferred_element_type=jnp.float32) + b_tile

    @pl.when(j == pl.num_programs(1) - 1)
    def _finalize():
        lse_ref[0] = max_sc[...] + jnp.log(sum_sc[...])  # (n, 1) partial LSE


def decoder_forward(fencs, enums_len, w_pos, w_out, b_out, dims, *, tile_v=None):
    """Decoder.forward: returns the (m, V) matrix of log-probabilities."""
    n, two_d = fencs.shape
    assert two_d == 2 * dims, "fencs must be (n, 2*dims)"
    V, d_w = w_out.shape
    assert d_w == dims
    d = dims
    # TODO(synk): enums_len must be a static Python int (mirrors the list-based
    # PyTorch API); a traced length under jit is not supported here.
    m = int(enums_len)
    assert 0 < m <= MAX_LEN, "len(enums) must be in (0, MAX_LEN]"

    f32 = jnp.float32
    fembs32 = fencs[:, :d].astype(f32)                   # (n, d)
    fpos32 = fencs[:, d:].astype(f32)                    # (n, d)
    q32 = w_pos[:m, :].astype(f32)                       # (m, d) = Embedding(arange(m))

    # ---- tiny attention softmax + qe in plain XLA (exact f32), hoisted out of
    #      the vocab sweep so nothing sits serially on the pipeline tail.
    s = q32 @ fpos32.T                                   # (m, n)
    w = jax.nn.softmax(s, axis=-1)                       # (m, n), rows sum to 1
    qe = (w @ fembs32).astype(jnp.bfloat16)              # (m, d) bf16 MXU operand

    fembs = fembs32.astype(jnp.bfloat16)                 # (n, d)
    woutT = w_out.T.astype(jnp.bfloat16)                 # (d, V) pre-transposed
    bias = b_out.astype(f32).reshape(1, V)               # (1, V)

    # ---- vocab tiling: lane-dense tile, 2-way "parallel" split over halves.
    budget = _vmem_budget_bytes()
    tv = _pick_tile_v(V, n, m, d, budget, hint=tile_v)
    tiles_per_half = int(pl.cdiv(pl.cdiv(V, tv), 2))
    v_pad = 2 * tiles_per_half * tv
    if v_pad != V:
        # Padded W columns are zero and padded bias is -1e30: they contribute
        # exp()==0 to the LSE (or saturate under the final logaddexp merge) and
        # the padded output columns are sliced off at the end.
        woutT = jnp.pad(woutT, ((0, 0), (0, v_pad - V)))
        bias = jnp.pad(bias, ((0, 0), (0, v_pad - V)), constant_values=_NEG_BIG)

    vtile_idx = lambda p, j: (0, p * tiles_per_half + j)

    o_partial, lse_halves = pl.pallas_call(
        _fused_vocab_kernel,
        out_shape=(jax.ShapeDtypeStruct((m, v_pad), jnp.float32),
                   jax.ShapeDtypeStruct((2, n, 1), jnp.float32)),
        grid_spec=pltpu.PrefetchScalarGridSpec(
            num_scalar_prefetch=0,
            grid=(2, tiles_per_half),
            in_specs=[pl.BlockSpec((n, d), lambda p, j: (0, 0)),     # fembs (resident)
                      pl.BlockSpec((m, d), lambda p, j: (0, 0)),     # qe    (resident)
                      pl.BlockSpec((d, tv), vtile_idx),              # W^T tile (streamed)
                      pl.BlockSpec((1, tv), vtile_idx)],             # bias tile
            out_specs=[pl.BlockSpec((m, tv), vtile_idx),             # o tile
                       pl.BlockSpec((1, n, 1), lambda p, j: (p, 0, 0))],  # LSE partial
            scratch_shapes=[pltpu.VMEM((n, 1), jnp.float32),         # running max
                            pltpu.VMEM((n, 1), jnp.float32)]),       # running sum-exp
        compiler_params=pltpu.CompilerParams(
            dimension_semantics=("parallel", "arbitrary"),  # megacore x reduction
            vmem_limit_bytes=budget),
    )(fembs, qe, woutT, bias)

    # ---- tiny XLA epilogue (fused with the slice): o = o_partial - w @ lse
    lse = jnp.logaddexp(lse_halves[0], lse_halves[1])    # (n, 1) merged LSE
    c = w @ lse                                          # (m, 1) exact f32
    return o_partial[:, :V] - c


def decoder_forward_ref(fencs, enums_len, w_pos, w_out, b_out, dims):
    """Plain-JAX f32 reference (mirrors the PyTorch forward)."""
    fembs = fencs[:, :dims]
    fpos = fencs[:, dims:]
    v = jax.nn.log_softmax(fembs @ w_out.T + b_out, axis=-1)
    q = w_pos[:enums_len, :]
    w = jax.nn.softmax(q @ fpos.T, axis=-1)
    return w @ v


if __name__ == "__main__":
    # Small shapes consistent with the module: n source words, m target words,
    # dims d, vocab size V (not a multiple of 128, to exercise padding + both
    # halves of the 2-way vocab split).
    d = 32          # self.dims
    V = 500         # len(evocab)
    n = 16          # source sentence length -> fencs is (n, 2d)
    m = 8           # English words (incl. <BOS>)

    key = jax.random.PRNGKey(0)
    k1, k2, k3, k4 = jax.random.split(key, 4)

    w_pos = jax.random.normal(k1, (MAX_LEN, d), dtype=jnp.float32) * 0.01
    w_out = jax.random.normal(k2, (V, d), dtype=jnp.float32) * 0.01
    b_out = jax.random.normal(k3, (V,), dtype=jnp.float32) * 0.01
    fencs = jax.random.normal(k4, (n, 2 * d), dtype=jnp.float32)

    out = decoder_forward(fencs, m, w_pos, w_out, b_out, d)
    out = jax.block_until_ready(out)

    ref = decoder_forward_ref(fencs, m, w_pos, w_out, b_out, d)
    assert out.shape == (m, V)
    # bf16 MXU operands (f32 accumulate / exact f32 softmax) vs f32 reference
    err = float(jnp.max(jnp.abs(out - ref)))
    assert jnp.allclose(out, ref, rtol=2e-3, atol=2e-3), f"max abs err {err}"

    print("KERNEL_OK")
</pallas_src>

<mosaic_0001>
module attributes {stable_mosaic.version = 11 : i64} {
  func.func @_fused_vocab_kernel(%arg0: i32, %arg1: i32, %arg2: memref<16x32xbf16, #tpu.memory_space<vmem>>, %arg3: memref<8x32xbf16, #tpu.memory_space<vmem>>, %arg4: memref<32x256xbf16, #tpu.memory_space<vmem>>, %arg5: memref<1x256xf32, #tpu.memory_space<vmem>>, %arg6: memref<8x256xf32, #tpu.memory_space<vmem>>, %arg7: memref<1x16x1xf32, #tpu.memory_space<vmem>>, %arg8: memref<16x1xf32, #tpu.memory_space<vmem>>, %arg9: memref<16x1xf32, #tpu.memory_space<vmem>>) attributes {dimension_semantics = [#tpu.dimension_semantics<parallel>, #tpu.dimension_semantics<arbitrary>], iteration_bounds = array<i64: 2, 1>, scalar_prefetch = 0 : i64, scratch_operands = 2 : i64, tpu.core_type = #tpu.core_type<tc>, window_params = [{pipeline_mode = #tpu.pipeline_mode<synchronous>, transform_indices = @transform_0, window_bounds = array<i64: 16, 32>}, {pipeline_mode = #tpu.pipeline_mode<synchronous>, transform_indices = @transform_1, window_bounds = array<i64: 8, 32>}, {transform_indices = @transform_2, window_bounds = array<i64: 32, 256>}, {transform_indices = @transform_3, window_bounds = array<i64: 1, 256>}, {transform_indices = @transform_4, window_bounds = array<i64: 8, 256>}, {transform_indices = @transform_5, window_bounds = array<i64: 1, 16, 1>}]} {
    %c0_i32 = arith.constant 0 : i32
    %0 = arith.cmpi eq, %arg1, %c0_i32 : i32
    %1 = arith.extui %0 : i1 to i32
    %c0_i32_0 = arith.constant 0 : i32
    %2 = arith.cmpi ne, %1, %c0_i32_0 : i32
    scf.if %2 {
      %cst_25 = arith.constant -1.000000e+30 : f32
      %34 = vector.broadcast %cst_25 : f32 to vector<16x1xf32>
      %c0_26 = arith.constant 0 : index
      %c0_27 = arith.constant 0 : index
      %35 = vector.load %arg8[%c0_26, %c0_27] : memref<16x1xf32, #tpu.memory_space<vmem>>, vector<16x1xf32>
      tpu.vector_store %arg8[%c0_26, %c0_27], %34 {strides = array<i32>} : memref<16x1xf32, #tpu.memory_space<vmem>>, vector<16x1xf32>,
      %cst_28 = arith.constant 0.000000e+00 : f32
      %36 = vector.broadcast %cst_28 : f32 to vector<16x1xf32>
      %c0_29 = arith.constant 0 : index
      %c0_30 = arith.constant 0 : index
      %37 = vector.load %arg9[%c0_29, %c0_30] : memref<16x1xf32, #tpu.memory_space<vmem>>, vector<16x1xf32>
      tpu.vector_store %arg9[%c0_29, %c0_30], %36 {strides = array<i32>} : memref<16x1xf32, #tpu.memory_space<vmem>>, vector<16x1xf32>,
    } else {
    }
    %c0 = arith.constant 0 : index
    %c0_1 = arith.constant 0 : index
    %3 = vector.load %arg4[%c0, %c0_1] : memref<32x256xbf16, #tpu.memory_space<vmem>>, vector<32x256xbf16>
    %c0_2 = arith.constant 0 : index
    %c0_3 = arith.constant 0 : index
    %4 = vector.load %arg5[%c0_2, %c0_3] : memref<1x256xf32, #tpu.memory_space<vmem>>, vector<1x256xf32>
    %c0_4 = arith.constant 0 : index
    %c0_5 = arith.constant 0 : index
    %5 = vector.load %arg2[%c0_4, %c0_5] : memref<16x32xbf16, #tpu.memory_space<vmem>>, vector<16x32xbf16>
    %cst = arith.constant dense<0.000000e+00> : vector<16x256xf32>
    %6 = tpu.matmul %5, %3, %cst {dimension_numbers = #tpu.dot_dimension_numbers<[1], [0], [0], [1], [0, 0, 1, 1], [], []>} : vector<16x32xbf16>, vector<32x256xbf16>, vector<16x256xf32> -> vector<16x256xf32>
    %7 = vector.broadcast %4 : vector<1x256xf32> to vector<16x256xf32>
    %8 = arith.addf %6, %7 : vector<16x256xf32>
    %c0_6 = arith.constant 0 : index
    %c0_7 = arith.constant 0 : index
    %9 = vector.load %arg8[%c0_6, %c0_7] : memref<16x1xf32, #tpu.memory_space<vmem>>, vector<16x1xf32>
    %cst_8 = arith.constant dense<0xFF800000> : vector<16xf32>
    %10 = vector.multi_reduction <maximumf>, %8, %cst_8 [1] : vector<16x256xf32> to vector<16xf32>
    %11 = vector.shape_cast %10 : vector<16xf32> to vector<16x1xf32>
    %12 = arith.maximumf %9, %11 : vector<16x1xf32>
    %c0_9 = arith.constant 0 : index
    %c0_10 = arith.constant 0 : index
    %13 = vector.load %arg9[%c0_9, %c0_10] : memref<16x1xf32, #tpu.memory_space<vmem>>, vector<16x1xf32>
    %c0_11 = arith.constant 0 : index
    %c0_12 = arith.constant 0 : index
    %14 = vector.load %arg8[%c0_11, %c0_12] : memref<16x1xf32, #tpu.memory_space<vmem>>, vector<16x1xf32>
    %15 = arith.subf %14, %12 : vector<16x1xf32>
    %16 = math.exp %15 : vector<16x1xf32>
    %17 = arith.mulf %13, %16 : vector<16x1xf32>
    %18 = vector.broadcast %12 : vector<16x1xf32> to vector<16x256xf32>
    %19 = arith.subf %8, %18 : vector<16x256xf32>
    %20 = math.exp %19 : vector<16x256xf32>
    %cst_13 = arith.constant dense<0.000000e+00> : vector<16xf32>
    %21 = vector.multi_reduction <add>, %20, %cst_13 [1] : vector<16x256xf32> to vector<16xf32>
    %22 = vector.shape_cast %21 : vector<16xf32> to vector<16x1xf32>
    %23 = arith.addf %17, %22 : vector<16x1xf32>
    %c0_14 = arith.constant 0 : index
    %c0_15 = arith.constant 0 : index
    %24 = vector.load %arg9[%c0_14, %c0_15] : memref<16x1xf32, #tpu.memory_space<vmem>>, vector<16x1xf32>
    tpu.vector_store %arg9[%c0_14, %c0_15], %23 {strides = array<i32>} : memref<16x1xf32, #tpu.memory_space<vmem>>, vector<16x1xf32>,
    %c0_16 = arith.constant 0 : index
    %c0_17 = arith.constant 0 : index
    %25 = vector.load %arg8[%c0_16, %c0_17] : memref<16x1xf32, #tpu.memory_space<vmem>>, vector<16x1xf32>
    tpu.vector_store %arg8[%c0_16, %c0_17], %12 {strides = array<i32>} : memref<16x1xf32, #tpu.memory_space<vmem>>, vector<16x1xf32>,
    %c0_18 = arith.constant 0 : index
    %c0_19 = arith.constant 0 : index
    %26 = vector.load %arg3[%c0_18, %c0_19] : memref<8x32xbf16, #tpu.memory_space<vmem>>, vector<8x32xbf16>
    %cst_20 = arith.constant dense<0.000000e+00> : vector<8x256xf32>
    %27 = tpu.matmul %26, %3, %cst_20 {dimension_numbers = #tpu.dot_dimension_numbers<[1], [0], [0], [1], [0, 0, 1, 1], [], []>} : vector<8x32xbf16>, vector<32x256xbf16>, vector<8x256xf32> -> vector<8x256xf32>
    %28 = vector.broadcast %4 : vector<1x256xf32> to vector<8x256xf32>
    %29 = arith.addf %27, %28 : vector<8x256xf32>
    %c0_21 = arith.constant 0 : index
    %c0_22 = arith.constant 0 : index
    %30 = vector.load %arg6[%c0_21, %c0_22] : memref<8x256xf32, #tpu.memory_space<vmem>>, vector<8x256xf32>
    tpu.vector_store %arg6[%c0_21, %c0_22], %29 {strides = array<i32>} : memref<8x256xf32, #tpu.memory_space<vmem>>, vector<8x256xf32>,
    %c0_i32_23 = arith.constant 0 : i32
    %31 = arith.cmpi eq, %arg1, %c0_i32_23 : i32
    %32 = arith.extui %31 : i1 to i32
    %c0_i32_24 = arith.constant 0 : i32
    %33 = arith.cmpi ne, %32, %c0_i32_24 : i32
    scf.if %33 {
      %c0_25 = arith.constant 0 : index
      %c0_26 = arith.constant 0 : index
      %34 = vector.load %arg8[%c0_25, %c0_26] : memref<16x1xf32, #tpu.memory_space<vmem>>, vector<16x1xf32>
      %c0_27 = arith.constant 0 : index
      %c0_28 = arith.constant 0 : index
      %35 = vector.load %arg9[%c0_27, %c0_28] : memref<16x1xf32, #tpu.memory_space<vmem>>, vector<16x1xf32>
      %36 = math.log %35 : vector<16x1xf32>
      %37 = arith.addf %34, %36 : vector<16x1xf32>
      %c0_29 = arith.constant 0 : index
      %c0_30 = arith.constant 0 : index
      %c0_31 = arith.constant 0 : index
      %38 = vector.load %arg7[%c0_29, %c0_30, %c0_31] : memref<1x16x1xf32, #tpu.memory_space<vmem>>, vector<1x16x1xf32>
      %39 = vector.shape_cast %38 : vector<1x16x1xf32> to vector<16x1xf32>
      %40 = vector.shape_cast %37 : vector<16x1xf32> to vector<1x16x1xf32>
      tpu.vector_store %arg7[%c0_29, %c0_30, %c0_31], %40 {strides = array<i32>} : memref<1x16x1xf32, #tpu.memory_space<vmem>>, vector<1x16x1xf32>,
    } else {
    }
    return
  }
  func.func @transform_0(%arg0: i32, %arg1: i32) -> (i32, i32) {
    %c0_i32 = arith.constant 0 : i32
    %c0_i32_0 = arith.constant 0 : i32
    %c0_i32_1 = arith.constant 0 : i32
    return %c0_i32, %c0_i32_0 : i32, i32
  }
  func.func @transform_1(%arg0: i32, %arg1: i32) -> (i32, i32) {
    %c0_i32 = arith.constant 0 : i32
    %c0_i32_0 = arith.constant 0 : i32
    %c0_i32_1 = arith.constant 0 : i32
    return %c0_i32, %c0_i32_0 : i32, i32
  }
  func.func @transform_2(%arg0: i32, %arg1: i32) -> (i32, i32) {
    %c1_i32 = arith.constant 1 : i32
    %0 = arith.muli %arg0, %c1_i32 : i32
    %1 = arith.addi %0, %arg1 : i32
    %c0_i32 = arith.constant 0 : i32
    %c0_i32_0 = arith.constant 0 : i32
    return %c0_i32, %1 : i32, i32
  }
  func.func @transform_3(%arg0: i32, %arg1: i32) -> (i32, i32) {
    %c1_i32 = arith.constant 1 : i32
    %0 = arith.muli %arg0, %c1_i32 : i32
    %1 = arith.addi %0, %arg1 : i32
    %c0_i32 = arith.constant 0 : i32
    %c0_i32_0 = arith.constant 0 : i32
    return %c0_i32, %1 : i32, i32
  }
  func.func @transform_4(%arg0: i32, %arg1: i32) -> (i32, i32) {
    %c1_i32 = arith.constant 1 : i32
    %0 = arith.muli %arg0, %c1_i32 : i32
    %1 = arith.addi %0, %arg1 : i32
    %c0_i32 = arith.constant 0 : i32
    %c0_i32_0 = arith.constant 0 : i32
    return %c0_i32, %1 : i32, i32
  }
  func.func @transform_5(%arg0: i32, %arg1: i32) -> (i32, i32, i32) {
    %c0_i32 = arith.constant 0 : i32
    %c0_i32_0 = arith.constant 0 : i32
    %c0_i32_1 = arith.constant 0 : i32
    return %arg0, %c0_i32, %c0_i32_0 : i32, i32, i32
  }
}

</mosaic_0001>

<bundles_post_ra>
// kernel: tpu_custom_call.1
= control target key start
LH: loop header
LB: loop body
LE: loop exit
PB: predicated region body
PF: predicated region fallthrough
CT: control target
= control target key end

     0   :  { %11 = vsyncpa [#allocation5], 0  ;;  %s1368_s0 = inlined_call_operand.hbm [shape: bf16[16,32], index: 0, kind: input, shape index: {}]   ;;  %s1369_s1 = inlined_call_operand.hbm [shape: bf16[8,32], index: 1, kind: input, shape index: {}]   ;;  %s1370_s2 = inlined_call_operand.hbm [shape: bf16[32,512], index: 2, kind: input, shape index: {}]   ;;  %s1371_s3 = inlined_call_operand.vmem [shape: f32[1,512], index: 3, kind: input, shape index: {}]   ;;  %s1372_s4 = inlined_call_operand.hbm [shape: f32[8,512], index: 4, kind: output, shape index: {0}]   ;;  %s1373_s5 = inlined_call_operand.vmem [shape: f32[2,16,1], index: 5, kind: output, shape index: {1}]  }
   0x1   :  { %12 = vsyncpa [#allocation8], 0 }
   0x2   :  { %13 = vsyncpa [#allocation6], 0 }
   0x3   :  { %15 = vsyncpa [#allocation6 + $0x1], 0  ;;  %s1070_s18 = smov 0   ;;  %s1072_s19 = smov 0  }
   0x4   :  { %s1074_s20 = smov 0   ;;  %s1076_s21 = smov 0  }
   0x5   :  { %s1078_s22 = smov 0   ;;  %s1080_s23 = smov 0  }
   0x6 LB: > { %s1101_s24 = sadd.s32 4294967295, %s1026_s23   ;;  %s703_s25 = sadd.s32 4294967294, %s1026_s23   ;;  %s1026_s23 = sphi %s1080_s23, %s21_s23   ;;  %s1022_s22 = sphi %s1078_s22, %s1400_s22   ;;  %s1018_s21 = sphi %s1076_s21, %s1399_s21   ;;  %s1014_s20 = sphi %s1074_s20, %s1398_s20   ;;  %s1010_s19 = sphi %s1072_s19, %s1397_s19   ;;  %s1006_s18 = sphi %s1070_s18, %s1396_s18  }
   0x7   : > { %p91_p0 = scmp.ne.s32.totalorder %s1014_s20, %s1010_s19  ;;  %p92_p1 = scmp.eq.s32.totalorder %s1026_s23, 0 }
   0x8   : > { %p97_p2 = scmp.ne.s32.totalorder %s1010_s19, %s1006_s18  ;;  %p1374_p3 = scmp.eq.s32.totalorder %s1101_s24, 0 }
   0x9   : > { %p151_p4 = scmp.eq.s32.totalorder %s1101_s24, 1  ;;  %p1112_p5 = por %p92_p1, %p91_p0 }
   0xa   : > { %p157_p6 = scmp.eq.s32.totalorder %s703_s25, 1  ;;  %p1118_p7 = por %p1374_p3, %p97_p2 }
   0xb   : > { %p1122_p8 = por %p151_p4, %p91_p0  ;;  %p704_p10 = scmp.ge.s32.totalorder %s1026_s23, 1 }
   0xc   : > { %s1379_s28 = scalar_select %p1118_p7, 1, 0 }
   0xd   : > { %s1380_s29 = scalar_select %p1122_p8, 1, 0 }
   0xe   : > { %p1126_p9 = por %p157_p6, %p97_p2  ;;  %p190_p11 = scmp.lt.s32.totalorder %s1026_s23, 3 }
   0xf   : > { %s1028_s7 = smov [#allocation4]   ;;  %p763_p1 = scmp.lt.s32.totalorder %s1026_s23, 2 }
  0x10   : > { %s1381_s30 = scalar_select %p1126_p9, 1, 0 }
  0x11   : > { %p1132_p12 = pnand %p704_p10, %p190_p11  ;;  %s202_s8 = sshll.u32 %s1028_s7, 4  ;;  %s1136_s8 = int_to_ptr.vmem [resolvable:$true] %s202_s8 }
  0x12   : > { %1382 = sst [smem:[#allocation15_spill]] %s1381_s30  ;;  %s1029_s10 = smov [#allocation7]  }
  0x13   : > { %p746_p13 = pneg %p1132_p12  ;;  %s216_s11 = sshll.u32 %s1029_s10, 4  ;;  %s1154_s11 = int_to_ptr.vmem [resolvable:$true] %s216_s11 }
  0x14   : > { %p1150_p4 = pnand %p763_p1, %p1112_p5  ;;  %s850_s15 = scalar_lea.hbm %s1368_s0, 128 }
  0x15   : > { %p1144_p2 = pnand %p746_p13, %p1374_p3  ;;  %p851_p6 = scmp.ne.s32.totalorder %s1368_s0, %s850_s15 }
  0x16   : > { %p857_p5 = scmp.lt.u32.totalorder %s850_s15, %s1368_s0 }
  0x17   : > { %p852_p10 = pneg %p1144_p2 }
  0x19   : > { %p853_p11 = pnand %p852_p10, %p851_p6 }
  0x1b   : > { %p854_p13 = pneg %p853_p11 }
  0x1d   : > { %p859_p1 = pnand %p857_p5, %p854_p13 }
  0x1f   : > { %862 = shalt.err (!%p859_p1)
}
  0x20   : > { %s863_s7 = scalar_lea.vmem %s1136_s8, 128  ;;  %p871_p8 = scmp.lt.s32.totalorder %s1136_s8, %s1136_s8 }
  0x21   : > { %p864_p0 = scmp.ne.s32.totalorder %s1136_s8, %s863_s7  ;;  %p872_p6 = scmp.lt.s32.totalorder %s863_s7, %s863_s7 }
  0x23   : > { %p866_p3 = pnand %p864_p0, %p852_p10  ;;  %p873_p11 = por %p872_p6, %p871_p8 }
  0x25   : > { %p867_p9 = pneg %p866_p3 }
  0x27   : > { %p874_p7 = pnand %p873_p11, %p867_p9 }
  0x29   : > { %877 = shalt.err (!%p874_p7)
}
  0x2a   : > { %s1030_s10 = smov 64   ;;  %s1031_s13 = smov 4  }
  0x2b   : > { %749 = dma.hbm_to_vmem [thread:$0]  (!%p1144_p2), %s1368_s0, 128, %s1136_s8, [#allocation5], %s1030_s10, %s1030_s10, %s1031_s13  }
  0x2c   : > { %s878_s25 = scalar_lea.hbm %s1369_s1, 64 }
  0x2d   : > { %p879_p3 = scmp.ne.s32.totalorder %s1369_s1, %s878_s25  ;;  %p885_p9 = scmp.lt.u32.totalorder %s878_s25, %s1369_s1 }
  0x2f   : > { %p881_p7 = pnand %p879_p3, %p852_p10 }
  0x31   : > { %p882_p8 = pneg %p881_p7 }
  0x33   : > { %p887_p0 = pnand %p885_p9, %p882_p8 }
  0x35   : > { %890 = shalt.err (!%p887_p0)
}
  0x36   : > { %s891_s8 = scalar_lea.vmem %s1154_s11, 64  ;;  %p899_p6 = scmp.lt.s32.totalorder %s1154_s11, %s1154_s11 }
  0x37   : > { %p892_p13 = scmp.ne.s32.totalorder %s1154_s11, %s891_s8  ;;  %p900_p11 = scmp.lt.s32.totalorder %s891_s8, %s891_s8 }
  0x39   : > { %p894_p5 = pnand %p892_p13, %p852_p10  ;;  %p901_p3 = por %p900_p11, %p899_p6 }
  0x3b   : > { %p895_p1 = pneg %p894_p5 }
  0x3d   : > { %p902_p7 = pnand %p901_p3, %p895_p1 }
  0x3f   : > { %905 = shalt.err (!%p902_p7)
}
  0x40   : > { %752 = dma.hbm_to_vmem [thread:$0]  (!%p1144_p2), %s1369_s1, 64, %s1154_s11, [#allocation8]  }
  0x41   : > { %s33_s10 = sadd.s32 1, %s1022_s22  ;;  %s227_s13 = sand.u32 1, %s1026_s23  }
  0x42   : > { %p35_p10 = scmp.ge.s32.totalorder %s33_s10, 2  ;;  %s229_s14 = sand.u32 1, %s1014_s20  }
  0x43   : > { %s731_s15 = sshll.u32 %s1022_s22, 7  ;;  %s708_s9 = sshll.u32 %s229_s14, 5 }
  0x44   : > { %s1402_s10 = smov (%p35_p10, %s33_s10), 0  ;;  %s1217_s25 = scalar_lea.hbm %s1370_s2, %s731_s15 }
  0x45   : > { %s81_s11 = ssub.s32 %s1022_s22, %s1402_s10  ;;  %s231_s27 = scalar_lea.vmem [#allocation9], %s708_s9 }
  0x46   : > { %p82_p2 = scmp.eq.s32.totalorder %s81_s11, 0  ;;  %s239_s7 = sshll.u32 %s231_s27, 4  ;;  %s1221_s7 = int_to_ptr.vmem [resolvable:$true] %s239_s7 }
  0x47   : > { %s1386_s8 = sadd.s32 1, %s1014_s20  ;;  %s1228_s30 = scalar_lea.sflag [#allocation5], %s227_s13 }
  0x48   : > { %s1226_s26 = scalar_select %p82_p2, %s1014_s20, %s1386_s8  }
  0x49   : > { %s906_s14 = scalar_lea.hbm %s1217_s25, 512  ;;  %p908_p9 = pneg %p1150_p4 }
  0x4a   : > { %p907_p8 = scmp.ne.s32.totalorder %s1217_s25, %s906_s14  ;;  %s911_s9 = scalar_lea.hbm %s1370_s2, 1024 }
  0x4b   : > { %p912_p5 = scmp.lt.u32.totalorder %s1217_s25, %s1370_s2  ;;  %p913_p1 = scmp.lt.u32.totalorder %s911_s9, %s906_s14 }
  0x4c   : > { %p909_p0 = pnand %p908_p9, %p907_p8  ;;  %p915_p11 = scmp.lt.u32.totalorder %s906_s14, %s1217_s25 }
  0x4d   : > { %p914_p6 = por %p913_p1, %p912_p5 }
  0x4e   : > { %p910_p13 = pneg %p909_p0 }
  0x4f   : > { %p916_p3 = por %p915_p11, %p914_p6 }
  0x51   : > { %p917_p7 = pnand %p916_p3, %p910_p13 }
  0x53   : > { %920 = shalt.err (!%p917_p7)
}
  0x54   : > { %s921_s13 = scalar_lea.vmem %s1221_s7, 512  ;;  %s1032_s27 = smov [#allocation9]  }
  0x55   : > { %p922_p10 = scmp.ne.s32.totalorder %s1221_s7, %s921_s13  ;;  %s926_s8 = sshll.u32 %s1032_s27, 4  ;;  %s927_s8 = int_to_ptr.vmem [resolvable:$false] %s926_s8 }
  0x56   : > { %s928_s15 = scalar_lea.vmem %s927_s8, 1024  ;;  %p929_p0 = scmp.lt.s32.totalorder %s1221_s7, %s927_s8 }
  0x57   : > { %p924_p2 = pnand %p922_p10, %p908_p9  ;;  %p930_p5 = scmp.lt.s32.totalorder %s928_s15, %s921_s13 }
  0x59   : > { %p925_p8 = pneg %p924_p2  ;;  %p931_p1 = por %p930_p5, %p929_p0 }
  0x5b   : > { %p932_p6 = pnand %p931_p1, %p925_p8 }
  0x5d   : > { %935 = shalt.err (!%p932_p6)
}
  0x5e   : > { %s1033_s14 = smov 256   ;;  %s1034_s16 = smov 128  }
  0x5f   : > { %s1035_s9 = smov 8   ;;  %261 = sbr.rel (%p1132_p12) target bundleno = 801 (0x321), region = 36 }
  0x60   : > { %756 = dma.hbm_to_vmem [thread:$0]  (!%p1150_p4), %s1217_s25, 512, %s1221_s7, %s1228_s30, %s1033_s14, %s1034_s16, %s1035_s9  }
  0x61   : > { %p1387_p9 = scmp.eq.s32.totalorder (!%p1132_p12), %s1101_s24, 0 }
  0x66   : > { %989 = dma.done.wait (%p1387_p9), [#allocation5], 128   ;;  %p1388_p13 = pmov %p1387_p9 }
  0x67   : > { %p1389_p11 = pmov %p1387_p9 }
  0x68   : > { %991 = vsyncadd (%p1388_p13), [#allocation5], 4294967168 }
  0x69   : > { %993 = dma.done.wait (%p1389_p11), [#allocation8], 64   ;;  %p1390_p3 = pmov %p1387_p9 }
  0x6a   : > { %s271_s12 = sand.u32 1, %s1101_s24   ;;  %s1268_s25 = sand.u32 1, %s1010_s19  }
  0x6b   : > { %995 = vsyncadd (%p1390_p3), [#allocation8], 4294967232  ;;  %s714_s6 = sshll.u32 %s1268_s25, 5  ;;  %s272_s7 = scalar_lea.sflag [#allocation5], %s271_s12 }
  0x6c   : > { %s275_s30 = scalar_lea.vmem [#allocation9], %s714_s6  ;;  %p1391_p12 = scmp.ne.s32.totalorder %s1379_s28, 0 }
  0x6e   : > { %997 = dma.done.wait (%p1391_p12), %s272_s7, 512  }
  0x6f   : > { %999 = vsyncadd (%p1391_p12), %s272_s7, 4294966784  ;;  %v1036_v0 = vmov 0   ;;  %v827_v1 = vld [vmem:[%s275_s30 + $0x4] ss:$8 sps:$4 sm:$0xff]   ;;  %v829_v2 = vld [vmem:[%s275_s30] ss:$8 sps:$4 sm:$0xff]   ;;  %v346_v7 = vlaneseq }
  0x70   : > { %417 = vmatprep.mubr.bf16.mxu0 %v1036_v0  ;;  %825 = vset.pattern.permute.xlu1 %v1036_v0  ;;  %v830_v3 = vld [vmem:[%s275_s30 + $0x14] ss:$8 sps:$4 sm:$0xff]   ;;  %v832_v4 = vld [vmem:[%s275_s30 + $0x10] ss:$8 sps:$4 sm:$0xff]   ;;  %vm381_vm0 = vcmask 261120   ;;  %vm333_vm1 = vcmask 7168  }
  0x71   : > { %519 = vmatprep.mubr.bf16.mxu1 %v1036_v0  ;;  %826 = vset.pattern.permute.xlu0 %v1036_v0  ;;  %v833_v5 = vld [vmem:[#allocation4] sm:$0xff]   ;;  %v1037_v6 = vmov -1e+30   ;;  %s716_s24 = sshll.u32 %s1018_s21, 1  ;;  %v347_v8 = vshrl.u32 %v346_v7, 7  ;;  %v1038_v24 = vmov 0.0  }
  0x72   : > { %385 = vmatprep.subr.bf16.mxu0 %v827_v1  ;;  %487 = vmatprep.subr.bf16.mxu1 %v827_v1  ;;  %334 = vst.msk [vmem:[#allocation2] sm:$0xff] %vm333_vm1, %v1037_v6  ;;  %335 = vst.msk [vmem:[#allocation2 + $0x8] sm:$0xff] %vm333_vm1, %v1037_v6  ;;  %p316_p4 = scmp.lt.s32.totalorder %s716_s24, 3  ;;  %v483_v25 = vld [vmem:[#allocation7] sm:$0xf]  ;;  %s715_s13 = sshll.u32 %s1268_s25, 4 }
  0x73   : > { %386 = vmatpush1.bf16.msra.mxu0 %v829_v2  ;;  %488 = vmatpush1.bf16.msra.mxu1 %v829_v2  ;;  %v348_v9 = vsub.s32 0, %v347_v8  ;;  %v352_v11 = vsub.s32 1, %v347_v8  ;;  %336 = vst.msk [vmem:[#allocation3] sm:$0xff] %vm333_vm1, %v1038_v24  ;;  %337 = vst.msk [vmem:[#allocation3 + $0x8] sm:$0xff] %vm333_vm1, %v1038_v24  ;;  %s304_s27 = scalar_lea.vmem [#allocation10], %s715_s13  ;;  %s733_s8 = sshll.u32 %s1018_s21, 8 }
  0x74   : > { %387 = vmatprep.subr.bf16.mxu0 %v830_v3  ;;  %489 = vmatprep.subr.bf16.mxu1 %v830_v3  ;;  %s1404_s24 = smov (!%p316_p4, %s716_s24), 3  ;;  %s566_s15 = sshll.u32 %s304_s27, 4  ;;  %s567_s15 = int_to_ptr.vmem [resolvable:$true] %s566_s15 }
  0x75   : > { %s318_s11 = scalar_lea.vmem %s1371_s3, %s1404_s24  ;;  %s1310_s9 = scalar_lea.hbm %s1372_s4, %s733_s8 }
  0x76   : > { %v342_v10 = vld [vmem:[%s318_s11] sm:$0x3]  ;;  %s546_s12 = scalar_lea.sflag [#allocation6], %s1268_s25  ;;  %s936_s6 = scalar_lea.vmem %s567_s15, 256 }
  0x77   : > { %388 = vmatpush1.bf16.msra.mxu0 %v832_v4  ;;  %490 = vmatpush1.bf16.msra.mxu1 %v832_v4  ;;  %v349_v12 = vrot.slane %v342_v10, %v348_v9  ;;  %v353_v13 = vrot.slane %v342_v10, %v352_v11  ;;  %p937_p7 = scmp.ne.s32.totalorder %s567_s15, %s936_s6  ;;  %p1392_p10 = scmp.ne.s32.totalorder %s1380_s29, 0 }
  0x78   : > { %s1039_s7 = smov [#allocation10]  }
  0x79   : > { %v1285_v26 = vld [vmem:[#allocation2] sm:$0xff]  ;;  %v1290_v29 = vld [vmem:[#allocation2 + $0x8] sm:$0xff]  ;;  %p938_p2 = pnand %p937_p7, %p1392_p10  ;;  %s940_s30 = sshll.u32 %s1039_s7, 4  ;;  %s941_s30 = int_to_ptr.vmem [resolvable:$false] %s940_s30 }
  0x7a   : > { %724 = vmatmul.mubr.msk.bf16.vlgmr.msra.gmra.mrb[0].mxu0 %vm381_vm0, %v833_v5  ;;  %725 = vmatmul.mubr.msk.bf16.vlgmr.msra.gmra.mrb[0].mxu1 %vm381_vm0, %v483_v25  ;;  %s942_s24 = scalar_lea.vmem %s941_s30, 512  ;;  %p943_p0 = scmp.lt.s32.totalorder %s567_s15, %s941_s30 }
  0x7b   : > { %p939_p8 = pneg %p938_p2  ;;  %p944_p5 = scmp.lt.s32.totalorder %s942_s24, %s936_s6 }
  0x7d   : > { %p945_p1 = por %p944_p5, %p943_p0 }
  0x7f   : > { %p946_p6 = pnand %p945_p1, %p939_p8 }
 0x14d   : > { %v419_v14 = vpop.f32.mrb[0].mxu0  ;;  %v521_v50 = vpop.f32.mrb[0].mxu1 }
 0x14e   : > { %v420_v15 = vadd.f32 %v419_v14, %v349_v12  ;;  %v421_v16 = vpop.f32.mrb[1].mxu0  ;;  %v523_v51 = vpop.f32.mrb[1].mxu1  ;;  %v522_v54 = vadd.f32 %v521_v50, %v349_v12 }
 0x14f   : > { %v422_v17 = vadd.f32 %v421_v16, %v353_v13  ;;  %v423_v18 = vpop.f32.mrb[2].mxu0  ;;  %v525_v52 = vpop.f32.mrb[2].mxu1  ;;  %v524_v55 = vadd.f32 %v523_v51, %v353_v13 }
 0x150   : > { %v425_v19 = vpop.f32.mrb[3].mxu0  ;;  %v424_v20 = vadd.f32 %v423_v18, %v349_v12  ;;  %v526_v53 = vpop.f32.mrb[3].mxu1  ;;  %528 = vst [vmem:[%s304_s27] sm:$0xff] %v522_v54 }
 0x151   : > { %v426_v21 = vadd.f32 %v425_v19, %v353_v13  ;;  %v430_v22 = vmax.f32 %v420_v15, %v422_v17  ;;  %529 = vst [vmem:[%s304_s27 + $0x8] sm:$0xff] %v524_v55 }
 0x153   : > { %431 = vmax.xlane.f32.xlu0 %v430_v22  ;;  %v433_v23 = vmax.f32 %v424_v20, %v426_v21 }
 0x157   : > { %434 = vmax.xlane.f32.xlu0 %v433_v23 }
 0x1e0   : > { %v432_v27 = vpop.xlane.xlu0 %431 }
 0x1e1   : > { %v1288_v28 = vmax.f32 %v1285_v26, %v432_v27 }
 0x1e3   : > { %v440_v30 = vsub.f32 %v1285_v26, %v1288_v28  ;;  %481 = vst.msk [vmem:[#allocation2] sm:$0xff] %vm333_vm1, %v1288_v28  ;;  %450 = vperm.xlu1 %825, %v1288_v28  }
 0x1e4   : > { %v435_v31 = vpop.xlane.xlu0 %434 }
 0x1e5   : > { %v1298_v32 = vmax.f32 %v1290_v29, %v435_v31 }
 0x1e7   : > { %v441_v33 = vsub.f32 %v1290_v29, %v1298_v32  ;;  %482 = vst.msk [vmem:[#allocation2 + $0x8] sm:$0xff] %vm333_vm1, %v1298_v32  ;;  %455 = vperm.xlu1 %825, %v1298_v32  }
 0x262   : > { %v451_v34 = vpop.permute.xlu1 %450 }
 0x263   : > { %v458_v35 = vsub.f32 %v420_v15, %v451_v34  ;;  %v459_v36 = vsub.f32 %v422_v17, %v451_v34 }
 0x265   : > { %v462_v37 = vmul.f32 1.442695, %v458_v35  ;;  %v464_v38 = vmul.f32 1.442695, %v459_v36 }
 0x266   : > { %v456_v39 = vpop.permute.xlu1 %455 }
 0x267   : > { %834 = vpow2.f32 %v462_v37  ;;  %v460_v40 = vsub.f32 %v424_v20, %v456_v39  ;;  %v461_v41 = vsub.f32 %v426_v21, %v456_v39 }
 0x268   : > { %836 = vpow2.f32 %v464_v38 }
 0x269   : > { %v466_v42 = vmul.f32 1.442695, %v460_v40  ;;  %v468_v43 = vmul.f32 1.442695, %v461_v41 }
 0x26b   : > { %838 = vpow2.f32 %v466_v42 }
 0x26c   : > { %840 = vpow2.f32 %v468_v43 }
 0x271   : > { %v835_v44 = vpop.eup %834 }
 0x272   : > { %v837_v45 = vpop.eup %836 }
 0x273   : > { %v470_v46 = vadd.f32 %v837_v45, %v835_v44 }
 0x275   : > { %v839_v47 = vpop.eup %838  ;;  %471 = vadd.xlane.f32.xlu0 %v470_v46 }
 0x276   : > { %v841_v48 = vpop.eup %840 }
 0x277   : > { %v473_v49 = vadd.f32 %v841_v48, %v839_v47 }
 0x279   : > { %474 = vadd.xlane.f32.xlu1 %v473_v49 }
 0x27a   : > { %949 = shalt.err (!%p946_p6)
}
 0x27b   : > { %s950_s25 = scalar_lea.hbm %s1310_s9, 256  ;;  %s954_s11 = scalar_lea.hbm %s1372_s4, 512 }
 0x27c   : > { %p951_p9 = scmp.ne.s32.totalorder %s1310_s9, %s950_s25  ;;  %p955_p3 = scmp.lt.u32.totalorder %s1310_s9, %s1372_s4 }
 0x27d   : > { %p956_p12 = scmp.lt.u32.totalorder %s954_s11, %s950_s25  ;;  %p958_p7 = scmp.lt.u32.totalorder %s950_s25, %s1310_s9 }
 0x27e   : > { %p952_p13 = pnand %p951_p9, %p1392_p10 }
 0x27f   : > { %p957_p4 = por %p956_p12, %p955_p3 }
 0x280   : > { %p953_p11 = pneg %p952_p13 }
 0x281   : > { %p959_p2 = por %p958_p7, %p957_p4 }
 0x283   : > { %p960_p8 = pnand %p959_p2, %p953_p11 }
 0x285   : > { %963 = shalt.err (!%p960_p8)
}
 0x286   : > { %744 = dma.vmem_to_hbm [thread:$0]  (%p1392_p10), %s567_s15, 256, %s1310_s9, %s546_s12   ;;  %v442_v56 = vmul.f32 1.442695, %v440_v30  ;;  %v444_v57 = vmul.f32 1.442695, %v441_v33  ;;  %v438_v59 = vld [vmem:[#allocation3] sm:$0xff] }
 0x287   : > { %v439_v63 = vld [vmem:[#allocation3 + $0x8] sm:$0xff]  ;;  %p323_p10 = scmp.lt.s32.totalorder %s1018_s21, 1  ;;  %v533_v8 = vld [vmem:[#allocation2] sm:$0xff]  ;;  %v534_v12 = vld [vmem:[#allocation2 + $0x8] sm:$0xff] }
 0x288   : > { %842 = vpow2.f32 %v442_v56 }
 0x289   : > { %844 = vpow2.f32 %v444_v57  ;;  %s1406_s21 = smov (!%p323_p10, %s1018_s21), 1 }
 0x28a   : > { %s732_s29 = sshll.u32 %s1406_s21, 4 }
 0x28b   : > { %s327_s14 = scalar_lea.vmem %s1373_s5, %s732_s29 }
 0x292   : > { %v843_v58 = vpop.eup %842 }
 0x293   : > { %v446_v60 = vmul.f32 %v843_v58, %v438_v59  ;;  %v845_v61 = vpop.eup %844 }
 0x294   : > { %v447_v1 = vmul.f32 %v845_v61, %v439_v63 }
 0x302   : > { %v472_v62 = vpop.xlane.xlu0 %471 }
 0x303   : > { %v476_v0 = vadd.f32 %v472_v62, %v446_v60 }
 0x305   : > { %479 = vst.msk [vmem:[#allocation3] sm:$0xff] %vm333_vm1, %v476_v0 }
 0x306   : > { %v475_v2 = vpop.xlane.xlu1 %474 }
 0x307   : > { %v477_v3 = vadd.f32 %v475_v2, %v447_v1 }
 0x309   : > { %480 = vst.msk [vmem:[#allocation3 + $0x8] sm:$0xff] %vm333_vm1, %v477_v3 }
 0x30c   : > { %v535_v4 = vld [vmem:[#allocation3] sm:$0xff] }
 0x30d   : > { %846 = vlog2.f32 %v535_v4 }
 0x310   : > { %v536_v5 = vld [vmem:[#allocation3 + $0x8] sm:$0xff] }
 0x311   : > { %848 = vlog2.f32 %v536_v5 }
 0x317   : > { %v847_v6 = vpop.eup %846 }
 0x318   : > { %v538_v7 = vmul.f32 0.6931472, %v847_v6 }
 0x31a   : > { %v541_v9 = vadd.f32 %v538_v7, %v533_v8 }
 0x31b   : > { %v849_v10 = vpop.eup %848 }
 0x31c   : > { %543 = vst.msk [vmem:[%s327_s14] sm:$0xff] %vm333_vm1, %v541_v9  ;;  %v540_v11 = vmul.f32 0.6931472, %v849_v10 }
 0x31e   : > { %v542_v13 = vadd.f32 %v540_v11, %v534_v12 }
 0x320   : > { %544 = vst.msk [vmem:[%s327_s14 + $0x8] sm:$0xff] %vm333_vm1, %v542_v13 }
 0x321 PF: > { %s1393_s16 = sld [smem:[#allocation15_spill]]  ;;  %s581_s21 = sand.u32 1, %s1006_s18  }
 0x322   : > { %p1395_p5 = scmp.ge.s32.totalorder %s1026_s23, 2  ;;  %s582_s9 = scalar_lea.sflag [#allocation6], %s581_s21 }
 0x327   : > { %p1394_p0 = scmp.ne.s32.totalorder %s1393_s16, 0 }
 0x329   : > { %p758_p1 = pnand %p1395_p5, %p1394_p0 }
 0x32b   : > { %1001 = dma.done.wait (!%p758_p1), %s582_s9, 256  }
 0x32c   : > { %1003 = vsyncadd (!%p758_p1), %s582_s9, 4294967040  ;;  %s21_s23 = sadd.s32 1, %s1026_s23   ;;  %s1396_s18 = smov %s1010_s19 }
 0x32d   : > { %p18_p6 = scmp.ge.s32.totalorder %s21_s23, 4   ;;  %s1397_s19 = smov %s1014_s20 }
 0x32e   : > { %s1398_s20 = smov %s1226_s26  ;;  %s1399_s21 = smov %s1022_s22 }
 0x32f   : > { %s1400_s22 = smov %s1402_s10  ;;  %20 = sbr.rel (!%p18_p6) target bundleno = 6 (0x6), region = 111 }
 0x336   :  { %595 = vsyncpa [#allocation5], 1 }
 0x337   :  { %597 = vsyncpa [#allocation5 + $0x1], 1 }
 0x338   :  { %598 = vsyncpa [#allocation8], 1 }
 0x339   :  { %599 = vsyncpa [#allocation6], 1 }
 0x33a   :  { %601 = vsyncpa [#allocation6 + $0x1], 1 }

</bundles_post_ra>
